<compile_context>
chip_gen: v6e
topology: v6e:2x2x1
jax: 0.10.0
libtpu: 0.0.40
codegen_flags: <defaults>
</compile_context>

<pallas_src>
import jax
import jax.numpy as jnp
from jax.experimental import pallas as pl
from jax.experimental.pallas import tpu as pltpu

_BN_EPS = 1e-5


def _vmem_cfg():
    """Generation-gated (vmem_limit_bytes, per-call tile budget)."""
    try:
        cap = int(pltpu.get_tpu_info().vmem_capacity_bytes)
    except Exception:
        cap = 64 * 1024 * 1024                       # conservative: v7x per-TC VMEM
    if cap >= 100 * 1024 * 1024:                     # v5e / v6e (128 MiB physical)
        return 96 * 1024 * 1024, 16 * 1024 * 1024
    # v7x (64 MiB per TensorCore): keep headroom for Mosaic internal scratch.
    return min(48 * 1024 * 1024, (cap * 3) // 4), 8 * 1024 * 1024


_VMEM_LIMIT, _TILE_BUDGET = _vmem_cfg()


def _choose_rows(nrows, max_rows):
    """Row-block Rb (multiple of 8, or == nrows) and possibly padded row count."""
    if nrows <= max_rows:
        return nrows, nrows
    mr = max(8, (max_rows // 8) * 8)
    for rb in range(mr, 7, -8):
        if nrows % rb == 0:
            return rb, nrows
    nrows_pad = ((nrows + mr - 1) // mr) * mr        # pad rows so the block divides
    return mr, nrows_pad


# ---------------------------------------------------------------------------
# Pass 1: per-batch per-channel branch sums + (3C,3C) Gram of the stacked branches.
# ---------------------------------------------------------------------------
def _stats_kernel(x1_ref, x2_ref, x3_ref, sum_ref, gram_ref):
    @pl.when(pl.program_id(2) == 0)
    def _():
        sum_ref[...] = jnp.zeros_like(sum_ref)
        gram_ref[...] = jnp.zeros_like(gram_ref)

    s = jnp.concatenate([x1_ref[0], x2_ref[0], x3_ref[0]], axis=0)      # (3C, Lb)
    sum_ref[0, 0] += jnp.sum(s.astype(jnp.float32), axis=1, keepdims=True)
    # Gram = S S^T, contracted over the lane axis (single small NT matmul on the MXU).
    gram_ref[0, 0] += jax.lax.dot_general(
        s, s, (((1,), (1,)), ((), ())), preferred_element_type=jnp.float32)


# ---------------------------------------------------------------------------
# Pass 2 (C < 8): gated sum + 1x1 conv (VPU MACs) + folded BN affine + ReLU.
# Blocks are (1, C, Rb, 128): dense (8,128) vregs, lane-dense output stores.
# ---------------------------------------------------------------------------
def _fused_out_vpu_kernel(g_ref, ws_ref, sh_ref, x1_ref, x2_ref, x3_ref, o_ref):
    b = pl.program_id(0)
    g1 = g_ref[b, 0]
    g2 = g_ref[b, 1]
    g3 = g_ref[b, 2]
    C = x1_ref.shape[1]
    z = (g1 * x1_ref[0].astype(jnp.float32)
         + g2 * x2_ref[0].astype(jnp.float32)
         + g3 * x3_ref[0].astype(jnp.float32))                           # (C, Rb, 128)
    for o in range(C):
        acc = z[0] * ws_ref[o, 0]
        for c in range(1, C):
            acc = acc + z[c] * ws_ref[o, c]
        acc = acc + sh_ref[o]
        o_ref[0, o] = jnp.maximum(acc, 0.0).astype(o_ref.dtype)


# ---------------------------------------------------------------------------
# Pass 2 (C >= 8): gated sum + 1x1 conv (MXU) + folded BN affine + ReLU.
# ---------------------------------------------------------------------------
def _fused_out_mxu_kernel(g_ref, ws_ref, sh_ref, x1_ref, x2_ref, x3_ref, o_ref):
    b = pl.program_id(0)
    z = (g_ref[b, 0] * x1_ref[0].astype(jnp.float32)
         + g_ref[b, 1] * x2_ref[0].astype(jnp.float32)
         + g_ref[b, 2] * x3_ref[0].astype(jnp.float32))                  # (C, Lb)
    conv = jnp.dot(ws_ref[...], z, preferred_element_type=jnp.float32) + sh_ref[...]
    o_ref[0] = jnp.maximum(conv, 0.0).astype(o_ref.dtype)


# ---------------------------------------------------------------------------
# Wrapper
# ---------------------------------------------------------------------------
@jax.jit
def agb_mean(x1, x2, x3, w1, w2, conv_w, conv_b, gamma, beta):
    f32 = jnp.float32
    B, C, H, W = x1.shape
    L = H * W
    out_dtype = x1.dtype
    in_item = jnp.dtype(x1.dtype).itemsize
    out_item = jnp.dtype(out_dtype).itemsize

    # channel-first (B, C, L): pure reshape of NCHW, no transposes.
    x1f = x1.reshape(B, C, L)
    x2f = x2.reshape(B, C, L)
    x3f = x3.reshape(B, C, L)

    # ---- tiling: lane-dense 128-wide rows; row blocks sized to the per-gen budget.
    nrows = pl.cdiv(L, 128)
    c8 = ((C + 7) // 8) * 8
    row_bytes = max(
        2 * 3 * c8 * 128 * in_item + 2 * (3 * C + 8) * 128 * 4,          # pass 1
        2 * C * 128 * (3 * in_item + out_item) + 2 * (C + 1) * 128 * 4,  # pass 2
    )
    max_rows = max(8, _TILE_BUDGET // row_bytes)
    rb, nrows_pad = _choose_rows(nrows, max_rows)
    Lpad = nrows_pad * 128
    if Lpad != L:
        pad = ((0, 0), (0, 0), (0, Lpad - L))
        x1f = jnp.pad(x1f, pad)
        x2f = jnp.pad(x2f, pad)
        x3f = jnp.pad(x3f, pad)
    Lb = rb * 128
    n_l_total = nrows_pad // rb
    # v7x: odd B -> expose an extra "parallel" split of L so both TensorCores stay
    # busy on the reduction pass (harmless no-op on v5e/v6e).
    lsplit = 2 if (B % 2 == 1 and n_l_total >= 2 and n_l_total % 2 == 0) else 1
    n_l = n_l_total // lsplit

    GA = 3 * C
    smem = pl.BlockSpec(memory_space=pltpu.MemorySpace.SMEM)
    vmem = pl.BlockSpec(memory_space=pltpu.MemorySpace.VMEM)
    x3d_spec = pl.BlockSpec((1, C, Lb), lambda b, s, l: (b, 0, s * n_l + l))

    # ---- pass 1: branch channel sums + Gram (reduction over L, accumulator-resident).
    sums_p, gram_p = pl.pallas_call(
        _stats_kernel,
        grid=(B, lsplit, n_l),
        in_specs=[x3d_spec, x3d_spec, x3d_spec],
        out_specs=(
            pl.BlockSpec((1, 1, GA, 1), lambda b, s, l: (b, s, 0, 0)),
            pl.BlockSpec((1, 1, GA, GA), lambda b, s, l: (b, s, 0, 0)),
        ),
        out_shape=(
            jax.ShapeDtypeStruct((B, lsplit, GA, 1), f32),
            jax.ShapeDtypeStruct((B, lsplit, GA, GA), f32),
        ),
        compiler_params=pltpu.CompilerParams(
            dimension_semantics=("parallel", "parallel", "arbitrary"),
            vmem_limit_bytes=_VMEM_LIMIT),
    )(x1f, x2f, x3f)

    sums = jnp.sum(sums_p[..., 0], axis=1)                  # (B, 3C)
    gram = jnp.sum(gram_p, axis=1)                          # (B, 3C, 3C)
    S = sums.reshape(B, 3, C)

    # tiny gate: mean over (c,h,w) -> Linear(3,3) -> ReLU -> Linear(3,3) -> Sigmoid
    tot = jnp.sum(S, axis=2) * (1.0 / (C * L))              # true-L divisor
    h = jnp.maximum(tot @ w1.astype(f32).T, 0.0)
    g = jax.nn.sigmoid(h @ w2.astype(f32).T)                # (B, 3)

    # analytic training-mode BatchNorm statistics of conv = W z + b, z = sum_i g_i x_i
    Wm = conv_w.reshape(C, C).astype(f32)
    bvec = conv_b.astype(f32)
    sumz = jnp.einsum('bi,bic->bc', g, S)                   # sum_l z        (B, C)
    Gr = gram.reshape(B, 3, C, 3, C)
    Zc = jnp.einsum('bi,bj,bicjd->bcd', g, g, Gr)           # sum_l z z^T    (B, C, C)
    n = float(B * L)
    zbar = jnp.sum(sumz, axis=0) / n
    cov = jnp.sum(Zc, axis=0) / n - jnp.outer(zbar, zbar)   # Cov(z) over (B, H, W)
    mu = Wm @ zbar + bvec
    var = jnp.einsum('oc,cd,od->o', Wm, cov, Wm)            # biased variance
    inv = jax.lax.rsqrt(var + _BN_EPS)
    scale = gamma.astype(f32) * inv
    shift = beta.astype(f32) - mu * scale
    # fold conv bias + BN affine into a single per-channel affine: y = relu(Ws z + sh)
    Ws = scale[:, None] * Wm                                # (C, C)
    sh = scale * bvec + shift                               # (C,)

    # ---- pass 2: fused gated-sum + 1x1 conv + BN affine + ReLU (single HBM write).
    if C < 8:
        x1r = x1f.reshape(B, C, nrows_pad, 128)
        x2r = x2f.reshape(B, C, nrows_pad, 128)
        x3r = x3f.reshape(B, C, nrows_pad, 128)
        x4d_spec = pl.BlockSpec((1, C, rb, 128), lambda b, l: (b, 0, l, 0))
        out4 = pl.pallas_call(
            _fused_out_vpu_kernel,
            grid=(B, n_l_total),
            in_specs=[smem, smem, smem, x4d_spec, x4d_spec, x4d_spec],
            out_specs=x4d_spec,
            out_shape=jax.ShapeDtypeStruct((B, C, nrows_pad, 128), out_dtype),
            compiler_params=pltpu.CompilerParams(
                dimension_semantics=("parallel", "parallel"),
                vmem_limit_bytes=_VMEM_LIMIT),
        )(g, Ws, sh, x1r, x2r, x3r)
        yflat = out4.reshape(B, C, Lpad)
    else:
        xl_spec = pl.BlockSpec((1, C, Lb), lambda b, l: (b, 0, l))
        yflat = pl.pallas_call(
            _fused_out_mxu_kernel,
            grid=(B, n_l_total),
            in_specs=[smem, vmem, vmem, xl_spec, xl_spec, xl_spec],
            out_specs=xl_spec,
            out_shape=jax.ShapeDtypeStruct((B, C, Lpad), out_dtype),
            compiler_params=pltpu.CompilerParams(
                dimension_semantics=("parallel", "parallel"),
                vmem_limit_bytes=_VMEM_LIMIT),
        )(g, Ws, sh.reshape(C, 1), x1f, x2f, x3f)

    if Lpad != L:
        yflat = yflat[:, :, :L]
    return yflat.reshape(B, C, H, W)


def reference(x1, x2, x3, w1, w2, conv_w, conv_b, gamma, beta):
    """Plain-JAX replica of the PyTorch AGB_mean forward (for verification)."""
    B, C, H, W = x1.shape
    y1 = jnp.mean(x1, axis=1, keepdims=True)
    y2 = jnp.mean(x2, axis=1, keepdims=True)
    y3 = jnp.mean(x3, axis=1, keepdims=True)
    y = jnp.concatenate([y1, y2, y3], axis=1)          # (B,3,H,W)
    y = jnp.mean(y, axis=(2, 3))                       # (B,3)
    y = jnp.maximum(y @ w1.T, 0.0)
    y = jax.nn.sigmoid(y @ w2.T)
    y = y[:, :, None, None]
    z = x1 * y[:, 0:1] + x2 * y[:, 1:2] + x3 * y[:, 2:3]
    conv = jnp.einsum('oc,bchw->bohw', conv_w.reshape(C, C), z) \
        + conv_b[None, :, None, None]
    mu = jnp.mean(conv, axis=(0, 2, 3), keepdims=True)
    var = jnp.mean((conv - mu) ** 2, axis=(0, 2, 3), keepdims=True)
    xhat = (conv - mu) / jnp.sqrt(var + _BN_EPS)
    return jnp.maximum(xhat * gamma[None, :, None, None]
                       + beta[None, :, None, None], 0.0)


if __name__ == "__main__":
    B, C, H, W = 2, 4, 16, 16
    key = jax.random.PRNGKey(0)
    k = jax.random.split(key, 9)

    x1 = jax.random.normal(k[0], (B, C, H, W), jnp.float32)
    x2 = jax.random.normal(k[1], (B, C, H, W), jnp.float32)
    x3 = jax.random.normal(k[2], (B, C, H, W), jnp.float32)

    # deterministic synthetic parameters (shapes per module __init__)
    w1 = 0.3 * jax.random.normal(k[3], (3, 3), jnp.float32)            # Linear(3,3)
    w2 = 0.3 * jax.random.normal(k[4], (3, 3), jnp.float32)            # Linear(3,3)
    conv_w = 0.2 * jax.random.normal(k[5], (C, C, 1, 1), jnp.float32)  # Conv2d 1x1
    conv_b = 0.1 * jax.random.normal(k[6], (C,), jnp.float32)          # Conv2d bias
    gamma = 1.0 + 0.1 * jax.random.normal(k[7], (C,), jnp.float32)     # BN weight
    beta = 0.1 * jax.random.normal(k[8], (C,), jnp.float32)            # BN bias

    out = agb_mean(x1, x2, x3, w1, w2, conv_w, conv_b, gamma, beta)
    out = jax.block_until_ready(out)

    ref = reference(x1, x2, x3, w1, w2, conv_w, conv_b, gamma, beta)
    assert out.shape == (B, C, H, W)
    assert jnp.allclose(out, ref, atol=1e-3, rtol=1e-3), \
        f"max abs diff {jnp.max(jnp.abs(out - ref))}"

    print("KERNEL_OK")
</pallas_src>

<mosaic_0001>
module attributes {stable_mosaic.version = 11 : i64} {
  func.func @_stats_kernel(%arg0: i32, %arg1: i32, %arg2: i32, %arg3: memref<1x4x256xf32, #tpu.memory_space<vmem>>, %arg4: memref<1x4x256xf32, #tpu.memory_space<vmem>>, %arg5: memref<1x4x256xf32, #tpu.memory_space<vmem>>, %arg6: memref<1x1x12x1xf32, #tpu.memory_space<vmem>>, %arg7: memref<1x1x12x12xf32, #tpu.memory_space<vmem>>) attributes {dimension_semantics = [#tpu.dimension_semantics<parallel>, #tpu.dimension_semantics<parallel>, #tpu.dimension_semantics<arbitrary>], iteration_bounds = array<i64: 2, 1, 1>, scalar_prefetch = 0 : i64, scratch_operands = 0 : i64, tpu.core_type = #tpu.core_type<tc>, window_params = [{transform_indices = @transform_0, window_bounds = array<i64: 1, 4, 256>}, {transform_indices = @transform_1, window_bounds = array<i64: 1, 4, 256>}, {transform_indices = @transform_2, window_bounds = array<i64: 1, 4, 256>}, {transform_indices = @transform_3, window_bounds = array<i64: 1, 1, 12, 1>}, {transform_indices = @transform_4, window_bounds = array<i64: 1, 1, 12, 12>}]} {
    %c0_i32 = arith.constant 0 : i32
    %0 = arith.cmpi eq, %arg2, %c0_i32 : i32
    %1 = arith.extui %0 : i1 to i32
    %c0_i32_0 = arith.constant 0 : i32
    %2 = arith.cmpi ne, %1, %c0_i32_0 : i32
    scf.if %2 {
      %cst_26 = arith.constant 0.000000e+00 : f32
      %25 = vector.broadcast %cst_26 : f32 to vector<1x1x12x1xf32>
      %c0_27 = arith.constant 0 : index
      %c0_28 = arith.constant 0 : index
      %c0_29 = arith.constant 0 : index
      %c0_30 = arith.constant 0 : index
      %26 = vector.load %arg6[%c0_27, %c0_28, %c0_29, %c0_30] : memref<1x1x12x1xf32, #tpu.memory_space<vmem>>, vector<1x1x12x1xf32>
      tpu.vector_store %arg6[%c0_27, %c0_28, %c0_29, %c0_30], %25 {strides = array<i32>} : memref<1x1x12x1xf32, #tpu.memory_space<vmem>>, vector<1x1x12x1xf32>,
      %cst_31 = arith.constant 0.000000e+00 : f32
      %27 = vector.broadcast %cst_31 : f32 to vector<1x1x12x12xf32>
      %c0_32 = arith.constant 0 : index
      %c0_33 = arith.constant 0 : index
      %c0_34 = arith.constant 0 : index
      %c0_35 = arith.constant 0 : index
      %28 = vector.load %arg7[%c0_32, %c0_33, %c0_34, %c0_35] : memref<1x1x12x12xf32, #tpu.memory_space<vmem>>, vector<1x1x12x12xf32>
      tpu.vector_store %arg7[%c0_32, %c0_33, %c0_34, %c0_35], %27 {strides = array<i32>} : memref<1x1x12x12xf32, #tpu.memory_space<vmem>>, vector<1x1x12x12xf32>,
    } else {
    }
    %c0 = arith.constant 0 : index
    %c0_1 = arith.constant 0 : index
    %c0_2 = arith.constant 0 : index
    %3 = vector.load %arg3[%c0, %c0_1, %c0_2] : memref<1x4x256xf32, #tpu.memory_space<vmem>>, vector<1x4x256xf32>
    %4 = vector.shape_cast %3 : vector<1x4x256xf32> to vector<4x256xf32>
    %c0_3 = arith.constant 0 : index
    %c0_4 = arith.constant 0 : index
    %c0_5 = arith.constant 0 : index
    %5 = vector.load %arg4[%c0_3, %c0_4, %c0_5] : memref<1x4x256xf32, #tpu.memory_space<vmem>>, vector<1x4x256xf32>
    %6 = vector.shape_cast %5 : vector<1x4x256xf32> to vector<4x256xf32>
    %c0_6 = arith.constant 0 : index
    %c0_7 = arith.constant 0 : index
    %c0_8 = arith.constant 0 : index
    %7 = vector.load %arg5[%c0_6, %c0_7, %c0_8] : memref<1x4x256xf32, #tpu.memory_space<vmem>>, vector<1x4x256xf32>
    %8 = vector.shape_cast %7 : vector<1x4x256xf32> to vector<4x256xf32>
    %9 = tpu.concatenate %4, %6, %8 in 0 : vector<4x256xf32>, vector<4x256xf32>, vector<4x256xf32> -> vector<12x256xf32>
    %c0_9 = arith.constant 0 : index
    %c0_10 = arith.constant 0 : index
    %c0_11 = arith.constant 0 : index
    %c0_12 = arith.constant 0 : index
    %10 = vector.load %arg6[%c0_9, %c0_10, %c0_11, %c0_12] : memref<1x1x12x1xf32, #tpu.memory_space<vmem>>, vector<1x1x12x1xf32>
    %11 = vector.shape_cast %10 : vector<1x1x12x1xf32> to vector<12x1xf32>
    %cst = arith.constant dense<0.000000e+00> : vector<12xf32>
    %12 = vector.multi_reduction <add>, %9, %cst [1] : vector<12x256xf32> to vector<12xf32>
    %13 = vector.shape_cast %12 : vector<12xf32> to vector<12x1xf32>
    %14 = arith.addf %11, %13 : vector<12x1xf32>
    %c0_13 = arith.constant 0 : index
    %c0_14 = arith.constant 0 : index
    %c0_15 = arith.constant 0 : index
    %c0_16 = arith.constant 0 : index
    %15 = vector.load %arg6[%c0_13, %c0_14, %c0_15, %c0_16] : memref<1x1x12x1xf32, #tpu.memory_space<vmem>>, vector<1x1x12x1xf32>
    %16 = vector.shape_cast %15 : vector<1x1x12x1xf32> to vector<12x1xf32>
    %17 = vector.shape_cast %14 : vector<12x1xf32> to vector<1x1x12x1xf32>
    tpu.vector_store %arg6[%c0_13, %c0_14, %c0_15, %c0_16], %17 {strides = array<i32>} : memref<1x1x12x1xf32, #tpu.memory_space<vmem>>, vector<1x1x12x1xf32>,
    %c0_17 = arith.constant 0 : index
    %c0_18 = arith.constant 0 : index
    %c0_19 = arith.constant 0 : index
    %c0_20 = arith.constant 0 : index
    %18 = vector.load %arg7[%c0_17, %c0_18, %c0_19, %c0_20] : memref<1x1x12x12xf32, #tpu.memory_space<vmem>>, vector<1x1x12x12xf32>
    %19 = vector.shape_cast %18 : vector<1x1x12x12xf32> to vector<12x12xf32>
    %cst_21 = arith.constant dense<0.000000e+00> : vector<12x12xf32>
    %20 = tpu.matmul %9, %9, %cst_21 {dimension_numbers = #tpu.dot_dimension_numbers<[1], [1], [0], [0], [0, 0, 1, 0], [], []>} : vector<12x256xf32>, vector<12x256xf32>, vector<12x12xf32> -> vector<12x12xf32>
    %21 = arith.addf %19, %20 : vector<12x12xf32>
    %c0_22 = arith.constant 0 : index
    %c0_23 = arith.constant 0 : index
    %c0_24 = arith.constant 0 : index
    %c0_25 = arith.constant 0 : index
    %22 = vector.load %arg7[%c0_22, %c0_23, %c0_24, %c0_25] : memref<1x1x12x12xf32, #tpu.memory_space<vmem>>, vector<1x1x12x12xf32>
    %23 = vector.shape_cast %22 : vector<1x1x12x12xf32> to vector<12x12xf32>
    %24 = vector.shape_cast %21 : vector<12x12xf32> to vector<1x1x12x12xf32>
    tpu.vector_store %arg7[%c0_22, %c0_23, %c0_24, %c0_25], %24 {strides = array<i32>} : memref<1x1x12x12xf32, #tpu.memory_space<vmem>>, vector<1x1x12x12xf32>,
    return
  }
  func.func @transform_0(%arg0: i32, %arg1: i32, %arg2: i32) -> (i32, i32, i32) {
    %c1_i32 = arith.constant 1 : i32
    %0 = arith.muli %arg1, %c1_i32 : i32
    %1 = arith.addi %0, %arg2 : i32
    %c0_i32 = arith.constant 0 : i32
    %c0_i32_0 = arith.constant 0 : i32
    return %arg0, %c0_i32, %1 : i32, i32, i32
  }
  func.func @transform_1(%arg0: i32, %arg1: i32, %arg2: i32) -> (i32, i32, i32) {
    %c1_i32 = arith.constant 1 : i32
    %0 = arith.muli %arg1, %c1_i32 : i32
    %1 = arith.addi %0, %arg2 : i32
    %c0_i32 = arith.constant 0 : i32
    %c0_i32_0 = arith.constant 0 : i32
    return %arg0, %c0_i32, %1 : i32, i32, i32
  }
  func.func @transform_2(%arg0: i32, %arg1: i32, %arg2: i32) -> (i32, i32, i32) {
    %c1_i32 = arith.constant 1 : i32
    %0 = arith.muli %arg1, %c1_i32 : i32
    %1 = arith.addi %0, %arg2 : i32
    %c0_i32 = arith.constant 0 : i32
    %c0_i32_0 = arith.constant 0 : i32
    return %arg0, %c0_i32, %1 : i32, i32, i32
  }
  func.func @transform_3(%arg0: i32, %arg1: i32, %arg2: i32) -> (i32, i32, i32, i32) {
    %c0_i32 = arith.constant 0 : i32
    %c0_i32_0 = arith.constant 0 : i32
    %c0_i32_1 = arith.constant 0 : i32
    return %arg0, %arg1, %c0_i32, %c0_i32_0 : i32, i32, i32, i32
  }
  func.func @transform_4(%arg0: i32, %arg1: i32, %arg2: i32) -> (i32, i32, i32, i32) {
    %c0_i32 = arith.constant 0 : i32
    %c0_i32_0 = arith.constant 0 : i32
    %c0_i32_1 = arith.constant 0 : i32
    return %arg0, %arg1, %c0_i32, %c0_i32_0 : i32, i32, i32, i32
  }
}

module attributes {stable_mosaic.version = 11 : i64} {
  func.func @_fused_out_vpu_kernel(%arg0: i32, %arg1: i32, %arg2: memref<2x3xf32, #tpu.memory_space<smem>>, %arg3: memref<4x4xf32, #tpu.memory_space<smem>>, %arg4: memref<4xf32, #tpu.memory_space<smem>>, %arg5: memref<1x4x2x128xf32, #tpu.memory_space<vmem>>, %arg6: memref<1x4x2x128xf32, #tpu.memory_space<vmem>>, %arg7: memref<1x4x2x128xf32, #tpu.memory_space<vmem>>, %arg8: memref<1x4x2x128xf32, #tpu.memory_space<vmem>>) attributes {dimension_semantics = [#tpu.dimension_semantics<parallel>, #tpu.dimension_semantics<parallel>], iteration_bounds = array<i64: 2, 1>, scalar_prefetch = 0 : i64, scratch_operands = 0 : i64, tpu.core_type = #tpu.core_type<tc>, window_params = [{transform_indices = @transform_0, window_bounds = array<i64: 2, 3>}, {transform_indices = @transform_1, window_bounds = array<i64: 4, 4>}, {transform_indices = @transform_2, window_bounds = array<i64: 4>}, {transform_indices = @transform_3, window_bounds = array<i64: 1, 4, 2, 128>}, {transform_indices = @transform_4, window_bounds = array<i64: 1, 4, 2, 128>}, {transform_indices = @transform_5, window_bounds = array<i64: 1, 4, 2, 128>}, {transform_indices = @transform_6, window_bounds = array<i64: 1, 4, 2, 128>}]} {
    %0 = arith.index_cast %arg0 : i32 to index
    %c0 = arith.constant 0 : index
    %1 = memref.load %arg2[%0, %c0] : memref<2x3xf32, #tpu.memory_space<smem>>
    %2 = arith.index_cast %arg0 : i32 to index
    %c1 = arith.constant 1 : index
    %3 = memref.load %arg2[%2, %c1] : memref<2x3xf32, #tpu.memory_space<smem>>
    %4 = arith.index_cast %arg0 : i32 to index
    %c2 = arith.constant 2 : index
    %5 = memref.load %arg2[%4, %c2] : memref<2x3xf32, #tpu.memory_space<smem>>
    %c0_0 = arith.constant 0 : index
    %c0_1 = arith.constant 0 : index
    %c0_2 = arith.constant 0 : index
    %c0_3 = arith.constant 0 : index
    %6 = vector.load %arg5[%c0_0, %c0_1, %c0_2, %c0_3] : memref<1x4x2x128xf32, #tpu.memory_space<vmem>>, vector<1x4x2x128xf32>
    %7 = vector.shape_cast %6 : vector<1x4x2x128xf32> to vector<4x2x128xf32>
    %8 = vector.broadcast %1 : f32 to vector<4x2x128xf32>
    %9 = arith.mulf %8, %7 : vector<4x2x128xf32>
    %c0_4 = arith.constant 0 : index
    %c0_5 = arith.constant 0 : index
    %c0_6 = arith.constant 0 : index
    %c0_7 = arith.constant 0 : index
    %10 = vector.load %arg6[%c0_4, %c0_5, %c0_6, %c0_7] : memref<1x4x2x128xf32, #tpu.memory_space<vmem>>, vector<1x4x2x128xf32>
    %11 = vector.shape_cast %10 : vector<1x4x2x128xf32> to vector<4x2x128xf32>
    %12 = vector.broadcast %3 : f32 to vector<4x2x128xf32>
    %13 = arith.mulf %12, %11 : vector<4x2x128xf32>
    %14 = arith.addf %9, %13 : vector<4x2x128xf32>
    %c0_8 = arith.constant 0 : index
    %c0_9 = arith.constant 0 : index
    %c0_10 = arith.constant 0 : index
    %c0_11 = arith.constant 0 : index
    %15 = vector.load %arg7[%c0_8, %c0_9, %c0_10, %c0_11] : memref<1x4x2x128xf32, #tpu.memory_space<vmem>>, vector<1x4x2x128xf32>
    %16 = vector.shape_cast %15 : vector<1x4x2x128xf32> to vector<4x2x128xf32>
    %17 = vector.broadcast %5 : f32 to vector<4x2x128xf32>
    %18 = arith.mulf %17, %16 : vector<4x2x128xf32>
    %19 = arith.addf %14, %18 : vector<4x2x128xf32>
    %20 = vector.extract_strided_slice %19 {offsets = [0, 0, 0], sizes = [1, 2, 128], strides = [1, 1, 1]} : vector<4x2x128xf32> to vector<1x2x128xf32>
    %21 = vector.shape_cast %20 : vector<1x2x128xf32> to vector<2x128xf32>
    %c0_12 = arith.constant 0 : index
    %c0_13 = arith.constant 0 : index
    %22 = memref.load %arg3[%c0_12, %c0_13] : memref<4x4xf32, #tpu.memory_space<smem>>
    %23 = vector.broadcast %22 : f32 to vector<2x128xf32>
    %24 = arith.mulf %21, %23 : vector<2x128xf32>
    %25 = vector.extract_strided_slice %19 {offsets = [1, 0, 0], sizes = [1, 2, 128], strides = [1, 1, 1]} : vector<4x2x128xf32> to vector<1x2x128xf32>
    %26 = vector.shape_cast %25 : vector<1x2x128xf32> to vector<2x128xf32>
    %c0_14 = arith.constant 0 : index
    %c1_15 = arith.constant 1 : index
    %27 = memref.load %arg3[%c0_14, %c1_15] : memref<4x4xf32, #tpu.memory_space<smem>>
    %28 = vector.broadcast %27 : f32 to vector<2x128xf32>
    %29 = arith.mulf %26, %28 : vector<2x128xf32>
    %30 = arith.addf %24, %29 : vector<2x128xf32>
    %31 = vector.extract_strided_slice %19 {offsets = [2, 0, 0], sizes = [1, 2, 128], strides = [1, 1, 1]} : vector<4x2x128xf32> to vector<1x2x128xf32>
    %32 = vector.shape_cast %31 : vector<1x2x128xf32> to vector<2x128xf32>
    %c0_16 = arith.constant 0 : index
    %c2_17 = arith.constant 2 : index
    %33 = memref.load %arg3[%c0_16, %c2_17] : memref<4x4xf32, #tpu.memory_space<smem>>
    %34 = vector.broadcast %33 : f32 to vector<2x128xf32>
    %35 = arith.mulf %32, %34 : vector<2x128xf32>
    %36 = arith.addf %30, %35 : vector<2x128xf32>
    %37 = vector.extract_strided_slice %19 {offsets = [3, 0, 0], sizes = [1, 2, 128], strides = [1, 1, 1]} : vector<4x2x128xf32> to vector<1x2x128xf32>
    %38 = vector.shape_cast %37 : vector<1x2x128xf32> to vector<2x128xf32>
    %c0_18 = arith.constant 0 : index
    %c3 = arith.constant 3 : index
    %39 = memref.load %arg3[%c0_18, %c3] : memref<4x4xf32, #tpu.memory_space<smem>>
    %40 = vector.broadcast %39 : f32 to vector<2x128xf32>
    %41 = arith.mulf %38, %40 : vector<2x128xf32>
    %42 = arith.addf %36, %41 : vector<2x128xf32>
    %c0_19 = arith.constant 0 : index
    %43 = memref.load %arg4[%c0_19] : memref<4xf32, #tpu.memory_space<smem>>
    %44 = vector.broadcast %43 : f32 to vector<2x128xf32>
    %45 = arith.addf %42, %44 : vector<2x128xf32>
    %cst = arith.constant 0.000000e+00 : f32
    %46 = vector.broadcast %cst : f32 to vector<2x128xf32>
    %47 = arith.maximumf %45, %46 : vector<2x128xf32>
    %c0_20 = arith.constant 0 : index
    %c0_21 = arith.constant 0 : index
    %c0_22 = arith.constant 0 : index
    %c0_23 = arith.constant 0 : index
    %48 = vector.load %arg8[%c0_20, %c0_21, %c0_22, %c0_23] : memref<1x4x2x128xf32, #tpu.memory_space<vmem>>, vector<1x1x2x128xf32>
    %49 = vector.shape_cast %48 : vector<1x1x2x128xf32> to vector<2x128xf32>
    %50 = vector.shape_cast %47 : vector<2x128xf32> to vector<1x1x2x128xf32>
    tpu.vector_store %arg8[%c0_20, %c0_21, %c0_22, %c0_23], %50 {strides = array<i32>} : memref<1x4x2x128xf32, #tpu.memory_space<vmem>>, vector<1x1x2x128xf32>,
    %51 = vector.extract_strided_slice %19 {offsets = [0, 0, 0], sizes = [1, 2, 128], strides = [1, 1, 1]} : vector<4x2x128xf32> to vector<1x2x128xf32>
    %52 = vector.shape_cast %51 : vector<1x2x128xf32> to vector<2x128xf32>
    %c1_24 = arith.constant 1 : index
    %c0_25 = arith.constant 0 : index
    %53 = memref.load %arg3[%c1_24, %c0_25] : memref<4x4xf32, #tpu.memory_space<smem>>
    %54 = vector.broadcast %53 : f32 to vector<2x128xf32>
    %55 = arith.mulf %52, %54 : vector<2x128xf32>
    %56 = vector.extract_strided_slice %19 {offsets = [1, 0, 0], sizes = [1, 2, 128], strides = [1, 1, 1]} : vector<4x2x128xf32> to vector<1x2x128xf32>
    %57 = vector.shape_cast %56 : vector<1x2x128xf32> to vector<2x128xf32>
    %c1_26 = arith.constant 1 : index
    %c1_27 = arith.constant 1 : index
    %58 = memref.load %arg3[%c1_26, %c1_27] : memref<4x4xf32, #tpu.memory_space<smem>>
    %59 = vector.broadcast %58 : f32 to vector<2x128xf32>
    %60 = arith.mulf %57, %59 : vector<2x128xf32>
    %61 = arith.addf %55, %60 : vector<2x128xf32>
    %62 = vector.extract_strided_slice %19 {offsets = [2, 0, 0], sizes = [1, 2, 128], strides = [1, 1, 1]} : vector<4x2x128xf32> to vector<1x2x128xf32>
    %63 = vector.shape_cast %62 : vector<1x2x128xf32> to vector<2x128xf32>
    %c1_28 = arith.constant 1 : index
    %c2_29 = arith.constant 2 : index
    %64 = memref.load %arg3[%c1_28, %c2_29] : memref<4x4xf32, #tpu.memory_space<smem>>
    %65 = vector.broadcast %64 : f32 to vector<2x128xf32>
    %66 = arith.mulf %63, %65 : vector<2x128xf32>
    %67 = arith.addf %61, %66 : vector<2x128xf32>
    %68 = vector.extract_strided_slice %19 {offsets = [3, 0, 0], sizes = [1, 2, 128], strides = [1, 1, 1]} : vector<4x2x128xf32> to vector<1x2x128xf32>
    %69 = vector.shape_cast %68 : vector<1x2x128xf32> to vector<2x128xf32>
    %c1_30 = arith.constant 1 : index
    %c3_31 = arith.constant 3 : index
    %70 = memref.load %arg3[%c1_30, %c3_31] : memref<4x4xf32, #tpu.memory_space<smem>>
    %71 = vector.broadcast %70 : f32 to vector<2x128xf32>
    %72 = arith.mulf %69, %71 : vector<2x128xf32>
    %73 = arith.addf %67, %72 : vector<2x128xf32>
    %c1_32 = arith.constant 1 : index
    %74 = memref.load %arg4[%c1_32] : memref<4xf32, #tpu.memory_space<smem>>
    %75 = vector.broadcast %74 : f32 to vector<2x128xf32>
    %76 = arith.addf %73, %75 : vector<2x128xf32>
    %cst_33 = arith.constant 0.000000e+00 : f32
    %77 = vector.broadcast %cst_33 : f32 to vector<2x128xf32>
    %78 = arith.maximumf %76, %77 : vector<2x128xf32>
    %c0_34 = arith.constant 0 : index
    %c1_35 = arith.constant 1 : index
    %c0_36 = arith.constant 0 : index
    %c0_37 = arith.constant 0 : index
    %79 = vector.load %arg8[%c0_34, %c1_35, %c0_36, %c0_37] : memref<1x4x2x128xf32, #tpu.memory_space<vmem>>, vector<1x1x2x128xf32>
    %80 = vector.shape_cast %79 : vector<1x1x2x128xf32> to vector<2x128xf32>
    %81 = vector.shape_cast %78 : vector<2x128xf32> to vector<1x1x2x128xf32>
    tpu.vector_store %arg8[%c0_34, %c1_35, %c0_36, %c0_37], %81 {strides = array<i32>} : memref<1x4x2x128xf32, #tpu.memory_space<vmem>>, vector<1x1x2x128xf32>,
    %82 = vector.extract_strided_slice %19 {offsets = [0, 0, 0], sizes = [1, 2, 128], strides = [1, 1, 1]} : vector<4x2x128xf32> to vector<1x2x128xf32>
    %83 = vector.shape_cast %82 : vector<1x2x128xf32> to vector<2x128xf32>
    %c2_38 = arith.constant 2 : index
    %c0_39 = arith.constant 0 : index
    %84 = memref.load %arg3[%c2_38, %c0_39] : memref<4x4xf32, #tpu.memory_space<smem>>
    %85 = vector.broadcast %84 : f32 to vector<2x128xf32>
    %86 = arith.mulf %83, %85 : vector<2x128xf32>
    %87 = vector.extract_strided_slice %19 {offsets = [1, 0, 0], sizes = [1, 2, 128], strides = [1, 1, 1]} : vector<4x2x128xf32> to vector<1x2x128xf32>
    %88 = vector.shape_cast %87 : vector<1x2x128xf32> to vector<2x128xf32>
    %c2_40 = arith.constant 2 : index
    %c1_41 = arith.constant 1 : index
    %89 = memref.load %arg3[%c2_40, %c1_41] : memref<4x4xf32, #tpu.memory_space<smem>>
    %90 = vector.broadcast %89 : f32 to vector<2x128xf32>
    %91 = arith.mulf %88, %90 : vector<2x128xf32>
    %92 = arith.addf %86, %91 : vector<2x128xf32>
    %93 = vector.extract_strided_slice %19 {offsets = [2, 0, 0], sizes = [1, 2, 128], strides = [1, 1, 1]} : vector<4x2x128xf32> to vector<1x2x128xf32>
    %94 = vector.shape_cast %93 : vector<1x2x128xf32> to vector<2x128xf32>
    %c2_42 = arith.constant 2 : index
    %c2_43 = arith.constant 2 : index
    %95 = memref.load %arg3[%c2_42, %c2_43] : memref<4x4xf32, #tpu.memory_space<smem>>
    %96 = vector.broadcast %95 : f32 to vector<2x128xf32>
    %97 = arith.mulf %94, %96 : vector<2x128xf32>
    %98 = arith.addf %92, %97 : vector<2x128xf32>
    %99 = vector.extract_strided_slice %19 {offsets = [3, 0, 0], sizes = [1, 2, 128], strides = [1, 1, 1]} : vector<4x2x128xf32> to vector<1x2x128xf32>
    %100 = vector.shape_cast %99 : vector<1x2x128xf32> to vector<2x128xf32>
    %c2_44 = arith.constant 2 : index
    %c3_45 = arith.constant 3 : index
    %101 = memref.load %arg3[%c2_44, %c3_45] : memref<4x4xf32, #tpu.memory_space<smem>>
    %102 = vector.broadcast %101 : f32 to vector<2x128xf32>
    %103 = arith.mulf %100, %102 : vector<2x128xf32>
    %104 = arith.addf %98, %103 : vector<2x128xf32>
    %c2_46 = arith.constant 2 : index
    %105 = memref.load %arg4[%c2_46] : memref<4xf32, #tpu.memory_space<smem>>
    %106 = vector.broadcast %105 : f32 to vector<2x128xf32>
    %107 = arith.addf %104, %106 : vector<2x128xf32>
    %cst_47 = arith.constant 0.000000e+00 : f32
    %108 = vector.broadcast %cst_47 : f32 to vector<2x128xf32>
    %109 = arith.maximumf %107, %108 : vector<2x128xf32>
    %c0_48 = arith.constant 0 : index
    %c2_49 = arith.constant 2 : index
    %c0_50 = arith.constant 0 : index
    %c0_51 = arith.constant 0 : index
    %110 = vector.load %arg8[%c0_48, %c2_49, %c0_50, %c0_51] : memref<1x4x2x128xf32, #tpu.memory_space<vmem>>, vector<1x1x2x128xf32>
    %111 = vector.shape_cast %110 : vector<1x1x2x128xf32> to vector<2x128xf32>
    %112 = vector.shape_cast %109 : vector<2x128xf32> to vector<1x1x2x128xf32>
    tpu.vector_store %arg8[%c0_48, %c2_49, %c0_50, %c0_51], %112 {strides = array<i32>} : memref<1x4x2x128xf32, #tpu.memory_space<vmem>>, vector<1x1x2x128xf32>,
    %113 = vector.extract_strided_slice %19 {offsets = [0, 0, 0], sizes = [1, 2, 128], strides = [1, 1, 1]} : vector<4x2x128xf32> to vector<1x2x128xf32>
    %114 = vector.shape_cast %113 : vector<1x2x128xf32> to vector<2x128xf32>
    %c3_52 = arith.constant 3 : index
    %c0_53 = arith.constant 0 : index
    %115 = memref.load %arg3[%c3_52, %c0_53] : memref<4x4xf32, #tpu.memory_space<smem>>
    %116 = vector.broadcast %115 : f32 to vector<2x128xf32>
    %117 = arith.mulf %114, %116 : vector<2x128xf32>
    %118 = vector.extract_strided_slice %19 {offsets = [1, 0, 0], sizes = [1, 2, 128], strides = [1, 1, 1]} : vector<4x2x128xf32> to vector<1x2x128xf32>
    %119 = vector.shape_cast %118 : vector<1x2x128xf32> to vector<2x128xf32>
    %c3_54 = arith.constant 3 : index
    %c1_55 = arith.constant 1 : index
    %120 = memref.load %arg3[%c3_54, %c1_55] : memref<4x4xf32, #tpu.memory_space<smem>>
    %121 = vector.broadcast %120 : f32 to vector<2x128xf32>
    %122 = arith.mulf %119, %121 : vector<2x128xf32>
    %123 = arith.addf %117, %122 : vector<2x128xf32>
    %124 = vector.extract_strided_slice %19 {offsets = [2, 0, 0], sizes = [1, 2, 128], strides = [1, 1, 1]} : vector<4x2x128xf32> to vector<1x2x128xf32>
    %125 = vector.shape_cast %124 : vector<1x2x128xf32> to vector<2x128xf32>
    %c3_56 = arith.constant 3 : index
    %c2_57 = arith.constant 2 : index
    %126 = memref.load %arg3[%c3_56, %c2_57] : memref<4x4xf32, #tpu.memory_space<smem>>
    %127 = vector.broadcast %126 : f32 to vector<2x128xf32>
    %128 = arith.mulf %125, %127 : vector<2x128xf32>
    %129 = arith.addf %123, %128 : vector<2x128xf32>
    %130 = vector.extract_strided_slice %19 {offsets = [3, 0, 0], sizes = [1, 2, 128], strides = [1, 1, 1]} : vector<4x2x128xf32> to vector<1x2x128xf32>
    %131 = vector.shape_cast %130 : vector<1x2x128xf32> to vector<2x128xf32>
    %c3_58 = arith.constant 3 : index
    %c3_59 = arith.constant 3 : index
    %132 = memref.load %arg3[%c3_58, %c3_59] : memref<4x4xf32, #tpu.memory_space<smem>>
    %133 = vector.broadcast %132 : f32 to vector<2x128xf32>
    %134 = arith.mulf %131, %133 : vector<2x128xf32>
    %135 = arith.addf %129, %134 : vector<2x128xf32>
    %c3_60 = arith.constant 3 : index
    %136 = memref.load %arg4[%c3_60] : memref<4xf32, #tpu.memory_space<smem>>
    %137 = vector.broadcast %136 : f32 to vector<2x128xf32>
    %138 = arith.addf %135, %137 : vector<2x128xf32>
    %cst_61 = arith.constant 0.000000e+00 : f32
    %139 = vector.broadcast %cst_61 : f32 to vector<2x128xf32>
    %140 = arith.maximumf %138, %139 : vector<2x128xf32>
    %c0_62 = arith.constant 0 : index
    %c3_63 = arith.constant 3 : index
    %c0_64 = arith.constant 0 : index
    %c0_65 = arith.constant 0 : index
    %141 = vector.load %arg8[%c0_62, %c3_63, %c0_64, %c0_65] : memref<1x4x2x128xf32, #tpu.memory_space<vmem>>, vector<1x1x2x128xf32>
    %142 = vector.shape_cast %141 : vector<1x1x2x128xf32> to vector<2x128xf32>
    %143 = vector.shape_cast %140 : vector<2x128xf32> to vector<1x1x2x128xf32>
    tpu.vector_store %arg8[%c0_62, %c3_63, %c0_64, %c0_65], %143 {strides = array<i32>} : memref<1x4x2x128xf32, #tpu.memory_space<vmem>>, vector<1x1x2x128xf32>,
    return
  }
  func.func @transform_0(%arg0: i32, %arg1: i32) -> (i32, i32) {
    %c0_i32 = arith.constant 0 : i32
    %c0_i32_0 = arith.constant 0 : i32
    %c0_i32_1 = arith.constant 0 : i32
    return %c0_i32, %c0_i32_0 : i32, i32
  }
  func.func @transform_1(%arg0: i32, %arg1: i32) -> (i32, i32) {
    %c0_i32 = arith.constant 0 : i32
    %c0_i32_0 = arith.constant 0 : i32
    %c0_i32_1 = arith.constant 0 : i32
    return %c0_i32, %c0_i32_0 : i32, i32
  }
  func.func @transform_2(%arg0: i32, %arg1: i32) -> i32 {
    %c0_i32 = arith.constant 0 : i32
    %c0_i32_0 = arith.constant 0 : i32
    return %c0_i32 : i32
  }
  func.func @transform_3(%arg0: i32, %arg1: i32) -> (i32, i32, i32, i32) {
    %c0_i32 = arith.constant 0 : i32
    %c0_i32_0 = arith.constant 0 : i32
    %c0_i32_1 = arith.constant 0 : i32
    return %arg0, %c0_i32, %arg1, %c0_i32_0 : i32, i32, i32, i32
  }
  func.func @transform_4(%arg0: i32, %arg1: i32) -> (i32, i32, i32, i32) {
    %c0_i32 = arith.constant 0 : i32
    %c0_i32_0 = arith.constant 0 : i32
    %c0_i32_1 = arith.constant 0 : i32
    return %arg0, %c0_i32, %arg1, %c0_i32_0 : i32, i32, i32, i32
  }
  func.func @transform_5(%arg0: i32, %arg1: i32) -> (i32, i32, i32, i32) {
    %c0_i32 = arith.constant 0 : i32
    %c0_i32_0 = arith.constant 0 : i32
    %c0_i32_1 = arith.constant 0 : i32
    return %arg0, %c0_i32, %arg1, %c0_i32_0 : i32, i32, i32, i32
  }
  func.func @transform_6(%arg0: i32, %arg1: i32) -> (i32, i32, i32, i32) {
    %c0_i32 = arith.constant 0 : i32
    %c0_i32_0 = arith.constant 0 : i32
    %c0_i32_1 = arith.constant 0 : i32
    return %arg0, %c0_i32, %arg1, %c0_i32_0 : i32, i32, i32, i32
  }
}

</mosaic_0001>

<bundles_post_ra>
// kernel: agb_mean.2
= control target key start
LH: loop header
LB: loop body
LE: loop exit
PB: predicated region body
PF: predicated region fallthrough
CT: control target
= control target key end

     0   :  { %s770_s15 = smov 0   ;;  %s772_s16 = smov 0   ;;  %s838_s0 = inlined_call_operand.vmem [shape: f32[2,4,256], index: 0, kind: input, shape index: {}]   ;;  %s839_s1 = inlined_call_operand.vmem [shape: f32[2,4,256], index: 1, kind: input, shape index: {}]   ;;  %s840_s2 = inlined_call_operand.vmem [shape: f32[2,4,256], index: 2, kind: input, shape index: {}]   ;;  %s841_s3 = inlined_call_operand.vmem [shape: f32[2,1,12,1], index: 3, kind: output, shape index: {0}]   ;;  %s842_s4 = inlined_call_operand.vmem [shape: f32[2,1,12,12], index: 4, kind: output, shape index: {1}]  }
   0x1   :  { %s774_s17 = smov 0  }
   0x2 LB: > { %s34_s18 = sadd.s32 1, %s738_s16  ;;  %p670_p0 = scmp.ge.s32.totalorder %s742_s17, 1  ;;  %s742_s17 = sphi %s774_s17, %s15_s17   ;;  %s738_s16 = sphi %s772_s16, %s844_s16   ;;  %s734_s15 = sphi %s770_s15, %s843_s15  }
   0x3   : > { %p36_p1 = scmp.ge.s32.totalorder %s34_s18, 2  ;;  %p241_p2 = scmp.lt.s32.totalorder %s742_s17, 3 }
   0x5   : > { %s846_s18 = smov (%p36_p1, %s34_s18), 0  ;;  %p242_p3 = pnand %p670_p0, %p241_p2 }
   0x6   : > { %p307_p4 = scmp.lt.s32.totalorder (!%p242_p3), %s734_s15, 1 }
   0x7   : > { %245 = sbr.rel (%p242_p3) target bundleno = 223 (0xdf), region = 32 }
   0xc   : > { %s848_s15 = smov (!%p307_p4, %s734_s15), 1  ;;  %vm363_vm0 = vcmask 7168   ;;  %vm383_vm1 = vcmask 1043456   ;;  %v744_v5 = vmov 0.0   ;;  %vm367_vm2 = vcmask 97280  }
   0xd   : > { %s683_s19 = sshll.u32 %s848_s15, 3  ;;  %s686_s20 = sshll.u32 %s848_s15, 4  ;;  %vm369_vm3 = vcmask 93184   ;;  %vm365_vm4 = vcmask 3072  }
   0xe   : > { %s338_s23 = scalar_lea.vmem %s840_s2, %s683_s19  ;;  %s314_s26 = scalar_lea.vmem %s838_s0, %s683_s19 }
   0xf   : > { %v373_v0 = vld [vmem:[%s338_s23] sm:$0xff]  ;;  %s326_s29 = scalar_lea.vmem %s839_s1, %s683_s19  ;;  %s806_s6 = scalar_lea.vmem %s841_s3, %s686_s20 }
  0x10   : > { %v371_v1 = vld [vmem:[%s314_s26] sm:$0xff]  ;;  %v381_v2 = vcombine.high %v373_v0, %v373_v0  ;;  %364 = vst.msk [vmem:[%s806_s6] sm:$0xff] %vm363_vm0, %v744_v5  ;;  %v391_v10 = vsel %vm383_vm1, %v373_v0, 0.0  ;;  %s358_s9 = scalar_lea.vmem %s842_s4, %s686_s20 }
  0x11   : > { %v372_v3 = vld [vmem:[%s326_s29] sm:$0xff]  ;;  %v375_v4 = vcombine.high %v371_v1, %v371_v1  ;;  %368 = vst.msk [vmem:[%s358_s9] sm:$0xff] %vm367_vm2, %v744_v5 }
  0x12   : > { %v378_v6 = vcombine.low %v372_v3, %v372_v3  ;;  %432 = vmatprep.subr.mxu0 %v381_v2  ;;  %688 = vmatprep.subr.mxu1 %v381_v2  ;;  %v392_v11 = vsel %vm383_vm1, %v381_v2, 0.0  ;;  %370 = vst.msk [vmem:[%s358_s9 + $0x8] sm:$0xf] %vm369_vm3, %v744_v5 }
  0x13   : > { %v385_v7 = vsel %vm383_vm1, %v375_v4, %v372_v3  ;;  %433 = vmatpush1.xpose.msra.mxu0 %v373_v0  ;;  %690 = vmatpush1.xpose.msra.mxu1 %v373_v0  ;;  %v393_v12 = vadd.f32 %v392_v11, %v391_v10  ;;  %366 = vst.msk [vmem:[%s806_s6 + $0x8] sm:$0xf] %vm365_vm4, %v744_v5 }
  0x14   : > { %v384_v8 = vsel %vm383_vm1, %v371_v1, %v378_v6  ;;  %434 = vmatprep.subr.mxu0 %v385_v7  ;;  %689 = vmatprep.subr.mxu1 %v385_v7 }
  0x15   : > { %v388_v9 = vadd.f32 %v385_v7, %v384_v8  ;;  %468 = vmatprep.mubr.f32.mxu0 %v385_v7  ;;  %473 = vmatprep.mubr.f32.mxu1 %v381_v2 }
  0x17   : > { %389 = vadd.xlane.f32.xlu0 %v388_v9  ;;  %435 = vmatpush1.xpose.msra.mxu0 %v384_v8  ;;  %v386_v13 = vld [vmem:[%s806_s6] sm:$0xff] }
  0x18   : > { %691 = vmatpush1.xpose.msra.mxu1 %v384_v8  ;;  %v402_v19 = vld [vmem:[%s358_s9] sm:$0xff] }
  0x19   : > { %v403_v20 = vld [vmem:[%s358_s9 + $0x8] sm:$0xf] }
  0x1a   : > { %469 = vmatmul.mubr.f32.vlgmr.msra.gmra.mxu0 %v384_v8  ;;  %v387_v16 = vld [vmem:[%s806_s6 + $0x8] sm:$0xf] }
  0x1b   : > { %474 = vmatmul.mubr.f32.vlgmr.msra.gmra.mxu1 %v373_v0  ;;  %394 = vadd.xlane.f32.xlu0 %v393_v12 }
  0xa0   : > { %v390_v14 = vpop.xlane.xlu0 %389 }
  0xa1   : > { %v396_v15 = vadd.f32 %v390_v14, %v386_v13 }
  0xa3   : > { %399 = vst.msk [vmem:[%s806_s6] sm:$0xff] %vm363_vm0, %v396_v15 }
  0xa4   : > { %v395_v17 = vpop.xlane.xlu0 %394 }
  0xa5   : > { %v397_v18 = vadd.f32 %v395_v17, %v387_v16 }
  0xa7   : > { %401 = vst.msk [vmem:[%s806_s6 + $0x8] sm:$0xf] %vm365_vm4, %v397_v18 }
  0xda   : > { %v470_v21 = vpop.f32.mrf.mxu0 }
  0xdb   : > { %v475_v22 = vpop.f32.mrf.mxu1  ;;  %v479_v23 = vadd.f32 %v470_v21, %v402_v19 }
  0xdc   : > { %v480_v24 = vadd.f32 %v475_v22, %v403_v20  ;;  %v472_v25 = vpop.f32.mrf.mxu0 }
  0xdd   : > { %v477_v26 = vpop.f32.mrf.mxu1  ;;  %482 = vst.msk [vmem:[%s358_s9] sm:$0xff] %vm367_vm2, %v479_v23 }
  0xde   : > { %484 = vst.msk [vmem:[%s358_s9 + $0x8] sm:$0xf] %vm369_vm3, %v480_v24 }
  0xdf PF: > { %s15_s17 = sadd.s32 1, %s742_s17   ;;  %s843_s15 = smov %s738_s16 }
  0xe0   : > { %p12_p5 = scmp.ge.s32.totalorder %s15_s17, 4   ;;  %s844_s16 = smov %s846_s18 }
  0xe2   :  { %14 = sbr.rel (!%p12_p5) target bundleno = 2 (0x2), region = 84 }

// kernel: agb_mean.3
= control target key start
LH: loop header
LB: loop body
LE: loop exit
PB: predicated region body
PF: predicated region fallthrough
CT: control target
= control target key end

     0   :  { %11 = vsyncpa [#allocation3], 0  ;;  %s1012_s0 = inlined_call_operand.vmem [shape: f32[2,3], index: 0, kind: input, shape index: {}]   ;;  %s1013_s1 = inlined_call_operand.vmem [shape: f32[4,4], index: 1, kind: input, shape index: {}]   ;;  %s1014_s2 = inlined_call_operand.vmem [shape: f32[4], index: 2, kind: input, shape index: {}]   ;;  %s1015_s3 = inlined_call_operand.vmem [shape: f32[2,4,2,128], index: 3, kind: input, shape index: {}]   ;;  %s1016_s4 = inlined_call_operand.vmem [shape: f32[2,4,2,128], index: 4, kind: input, shape index: {}]   ;;  %s1017_s5 = inlined_call_operand.vmem [shape: f32[2,4,2,128], index: 5, kind: input, shape index: {}]   ;;  %s1018_s6 = inlined_call_operand.vmem [shape: f32[2,4,2,128], index: 6, kind: output, shape index: {}]  }
   0x1   :  { %12 = vsyncpa [#allocation5], 0  ;;  %s876_s21 = smov 0   ;;  %s878_s22 = smov 0  }
   0x2   :  { %s880_s23 = smov 0  }
   0x3 LB: > { %s234_s26 = sshll.u32 %s1013_s1, 4  ;;  %s659_s27 = sadd.s32 4294967295, %s836_s23   ;;  %s836_s23 = sphi %s880_s23, %s18_s23   ;;  %s832_s22 = sphi %s878_s22, %s1029_s22   ;;  %s828_s21 = sphi %s876_s21, %s1028_s21   ;;  %s235_s26 = int_to_ptr.vmem [resolvable:$true] %s234_s26 }
   0x4   : > { %p661_p0 = scmp.ge.s32.totalorder %s836_s23, 1  ;;  %p210_p1 = scmp.lt.s32.totalorder %s836_s23, 3 }
   0x5   : > { %p897_p2 = scmp.eq.s32.totalorder %s659_s27, 0  ;;  %s30_s30 = sadd.s32 1, %s832_s22 }
   0x6   : > { %p901_p3 = pnand %p661_p0, %p210_p1  ;;  %s223_s9 = sshll.u32 %s1012_s0, 4  ;;  %s224_s9 = int_to_ptr.vmem [resolvable:$true] %s223_s9 }
   0x7   : > { %s1022_s28 = scalar_select %p897_p2, 1, 0 }
   0x8   : > { %s1023_s29 = scalar_select %p901_p3, 1, 0 }
   0x9   : > { %p718_p4 = pneg %p901_p3  ;;  %p917_p6 = scmp.ge.s32.totalorder %s30_s30, 2 }
   0xa   : > { %s245_s14 = sshll.u32 %s1014_s2, 4  ;;  %s761_s15 = scalar_lea.vmem %s235_s26, 64  ;;  %s246_s14 = int_to_ptr.vmem [resolvable:$true] %s245_s14 }
   0xb   : > { %p913_p5 = pnand %p897_p2, %p718_p4  ;;  %p762_p7 = scmp.ne.s32.totalorder %s235_s26, %s761_s15 }
   0xc   : > { %p769_p11 = scmp.lt.s32.totalorder %s235_s26, %s235_s26  ;;  %p770_p12 = scmp.lt.s32.totalorder %s761_s15, %s761_s15 }
   0xd   : > { %p763_p8 = pneg %p913_p5 }
   0xe   : > { %p771_p13 = por %p770_p12, %p769_p11 }
   0xf   : > { %p764_p9 = pnand %p763_p8, %p762_p7 }
  0x11   : > { %p765_p10 = pneg %p764_p9 }
  0x13   : > { %p772_p0 = pnand %p771_p13, %p765_p10 }
  0x15   : > { %775 = shalt.err (!%p772_p0)
}
  0x16   : > { %s838_s16 = smov [#allocation4]   ;;  %s1031_s30 = smov (%p917_p6, %s30_s30), 0 }
  0x17   : > { %724 = dma.vmem_to_smem (!%p913_p5), %s235_s26, 64, %s838_s16, [#allocation5]  }
  0x18   : > { %s776_s17 = scalar_lea.vmem %s224_s9, 32  ;;  %p784_p9 = scmp.lt.s32.totalorder %s224_s9, %s224_s9 }
  0x19   : > { %p777_p1 = scmp.ne.s32.totalorder %s224_s9, %s776_s17  ;;  %p785_p2 = scmp.lt.s32.totalorder %s776_s17, %s776_s17 }
  0x1b   : > { %p779_p4 = pnand %p777_p1, %p763_p8  ;;  %p786_p11 = por %p785_p2, %p784_p9 }
  0x1d   : > { %p780_p7 = pneg %p779_p4 }
  0x1f   : > { %p787_p10 = pnand %p786_p11, %p780_p7 }
  0x21   : > { %790 = shalt.err (!%p787_p10)
}
  0x22   : > { %s839_s18 = smov [#allocation2]   ;;  %s791_s19 = scalar_lea.vmem %s246_s14, 16 }
  0x23   : > { %721 = dma.vmem_to_smem (!%p913_p5), %s224_s9, 32, %s839_s18, [#allocation3]  }
  0x24   : > { %p792_p6 = scmp.ne.s32.totalorder %s246_s14, %s791_s19  ;;  %p799_p0 = scmp.lt.s32.totalorder %s246_s14, %s246_s14 }
  0x25   : > { %p800_p1 = scmp.lt.s32.totalorder %s791_s19, %s791_s19 }
  0x26   : > { %p794_p12 = pnand %p792_p6, %p763_p8 }
  0x27   : > { %p801_p4 = por %p800_p1, %p799_p0 }
  0x28   : > { %p795_p13 = pneg %p794_p12 }
  0x2a   : > { %p802_p3 = pnand %p801_p4, %p795_p13 }
  0x2c   : > { %805 = shalt.err (!%p802_p3)
}
  0x2d   : > { %s840_s20 = smov [#allocation6]   ;;  %p1026_p2 = scmp.ne.s32.totalorder %s1023_s29, 0 }
  0x2e   : > { %727 = dma.vmem_to_smem (!%p913_p5), %s246_s14, 16, %s840_s20, [#allocation5]  }
  0x2f   : > { %291 = sbr.rel (%p1026_p2) target bundleno = 102 (0x66), region = 44  ;;  %p1027_p7 = scmp.ne.s32.totalorder (!%p1026_p2), %s1022_s28, 0 }
  0x34   : > { %819 = dma.done.wait (%p1027_p7), [#allocation3], 32  }
  0x35   : > { %821 = vsyncadd (%p1027_p7), [#allocation3], 4294967264 }
  0x36   : > { %823 = dma.done.wait (%p1027_p7), [#allocation5], 80  }
  0x37   : > { %825 = vsyncadd (%p1027_p7), [#allocation5], 4294967216 }
  0x38   : > { %305 = sfence }
  0x39   : > { %p352_p3 = scmp.lt.s32.totalorder %s828_s21, 1  ;;  %s678_s24 = sshll.u32 %s828_s21, 7 }
  0x3a   : > { %s385_s25 = sld [smem:[#allocation2 + %s678_s24]]  ;;  %s386_s26 = sadd.s32 1, %s678_s24 }
  0x3b   : > { %s1033_s21 = smov (!%p352_p3, %s828_s21), 1  ;;  %s387_s27 = sld [smem:[#allocation2 + %s386_s26]] }
  0x3c   : > { %s388_s29 = sadd.s32 2, %s678_s24  ;;  %s958_s7 = sshll.u32 %s1033_s21, 3 }
  0x3d   : > { %s389_s8 = sld [smem:[#allocation2 + %s388_s29]]  ;;  %s359_s10 = scalar_lea.vmem %s1015_s3, %s958_s7 }
  0x3e   : > { %s367_s13 = scalar_lea.vmem %s1016_s4, %s958_s7  ;;  %s375_s16 = scalar_lea.vmem %s1017_s5, %s958_s7  ;;  %v390_v0 = vld [vmem:[%s359_s10] sm:$0x3]  ;;  %v391_v1 = vld [vmem:[%s359_s10 + $0x2] sm:$0x3]  ;;  %v392_v2 = vld [vmem:[%s359_s10 + $0x4] sm:$0x3] }
  0x3f   : > { %v393_v3 = vld [vmem:[%s359_s10 + $0x6] sm:$0x3]  ;;  %v399_v5 = vld [vmem:[%s367_s13] sm:$0x3]  ;;  %v400_v6 = vld [vmem:[%s367_s13 + $0x2] sm:$0x3] }
  0x40   : > { %v394_v4 = vstv %s385_s25  ;;  %v401_v11 = vld [vmem:[%s367_s13 + $0x4] sm:$0x3]  ;;  %v402_v12 = vld [vmem:[%s367_s13 + $0x6] sm:$0x3]  ;;  %v412_v14 = vld [vmem:[%s375_s16] sm:$0x3] }
  0x41   : > { %v395_v7 = vmul.f32 %v394_v4, %v390_v0  ;;  %v396_v8 = vmul.f32 %v394_v4, %v391_v1  ;;  %v397_v9 = vmul.f32 %v394_v4, %v392_v2  ;;  %v398_v10 = vmul.f32 %v394_v4, %v393_v3  ;;  %v413_v15 = vld [vmem:[%s375_s16 + $0x2] sm:$0x3]  ;;  %v414_v20 = vld [vmem:[%s375_s16 + $0x4] sm:$0x3]  ;;  %v415_v21 = vld [vmem:[%s375_s16 + $0x6] sm:$0x3]  ;;  %s991_s16 = scalar_lea.vmem %s1018_s6, %s958_s7 }
  0x42   : > { %v403_v13 = vstv %s387_s27  ;;  %s425_s21 = sld [smem:[#allocation4]] }
  0x43   : > { %v404_v16 = vmul.f32 %v403_v13, %v399_v5  ;;  %v405_v17 = vmul.f32 %v403_v13, %v400_v6  ;;  %v406_v18 = vmul.f32 %v403_v13, %v401_v11  ;;  %v407_v19 = vmul.f32 %v403_v13, %v402_v12  ;;  %s679_s17 = sld [smem:[#allocation4 + $0x1]] }
  0x44   : > { %v416_v22 = vstv %s389_s8  ;;  %s680_s18 = sld [smem:[#allocation4 + $0x2]] }
  0x45   : > { %v408_v23 = vadd.f32 %v404_v16, %v395_v7  ;;  %v409_v24 = vadd.f32 %v405_v17, %v396_v8  ;;  %v410_v25 = vadd.f32 %v406_v18, %v397_v9  ;;  %v411_v26 = vadd.f32 %v407_v19, %v398_v10  ;;  %s681_s19 = sld [smem:[#allocation4 + $0x3]] }
  0x46   : > { %v417_v27 = vmul.f32 %v416_v22, %v412_v14  ;;  %v418_v28 = vmul.f32 %v416_v22, %v413_v15  ;;  %v419_v29 = vmul.f32 %v416_v22, %v414_v20  ;;  %v420_v30 = vmul.f32 %v416_v22, %v415_v21  ;;  %s972_s20 = sld [smem:[#allocation6]] }
  0x47   : > { %s682_s24 = sld [smem:[#allocation4 + $0x80]] }
  0x48   : > { %v421_v31 = vadd.f32 %v417_v27, %v408_v23  ;;  %v422_v32 = vadd.f32 %v418_v28, %v409_v24  ;;  %v974_v33 = vadd.f32 %v419_v29, %v410_v25  ;;  %v976_v34 = vadd.f32 %v420_v30, %v411_v26  ;;  %s683_s25 = sld [smem:[#allocation4 + $0x81]] }
  0x49   : > { %v426_v35 = vstv %s425_s21  ;;  %v429_v37 = vstv %s679_s17  ;;  %s684_s26 = sld [smem:[#allocation4 + $0x82]] }
  0x4a   : > { %v427_v36 = vmul.f32 %v426_v35, %v421_v31  ;;  %v430_v38 = vmul.f32 %v429_v37, %v422_v32  ;;  %v433_v39 = vstv %s680_s18  ;;  %s685_s27 = sld [smem:[#allocation4 + $0x83]] }
  0x4b   : > { %v434_v40 = vmul.f32 %v433_v39, %v974_v33  ;;  %v437_v41 = vstv %s681_s19  ;;  %s979_s29 = sld [smem:[#allocation6 + $0x1]] }
  0x4c   : > { %v431_v42 = vadd.f32 %v430_v38, %v427_v36  ;;  %v438_v43 = vmul.f32 %v437_v41, %v976_v34  ;;  %s688_s8 = sld [smem:[#allocation4 + $0x100]]  ;;  %v441_v48 = vstv %s972_s20 }
  0x4d   : > { %v446_v44 = vstv %s682_s24  ;;  %s689_s9 = sld [smem:[#allocation4 + $0x101]] }
  0x4e   : > { %v435_v45 = vadd.f32 %v434_v40, %v431_v42  ;;  %v447_v46 = vmul.f32 %v446_v44, %v421_v31  ;;  %v449_v47 = vstv %s683_s25  ;;  %s690_s28 = sld [smem:[#allocation4 + $0x102]] }
  0x4f   : > { %v450_v49 = vmul.f32 %v449_v47, %v422_v32  ;;  %v453_v50 = vstv %s684_s26  ;;  %s691_s10 = sld [smem:[#allocation4 + $0x103]] }
  0x50   : > { %v439_v51 = vadd.f32 %v438_v43, %v435_v45  ;;  %v454_v52 = vmul.f32 %v453_v50, %v974_v33  ;;  %v457_v53 = vstv %s685_s27  ;;  %s984_s11 = sld [smem:[#allocation6 + $0x2]] }
  0x51   : > { %v451_v54 = vadd.f32 %v450_v49, %v447_v46  ;;  %v458_v55 = vmul.f32 %v457_v53, %v976_v34  ;;  %s694_s12 = sld [smem:[#allocation4 + $0x180]]  ;;  %v461_v62 = vstv %s979_s29 }
  0x52   : > { %v442_v56 = vadd.f32 %v441_v48, %v439_v51  ;;  %v467_v57 = vstv %s688_s8  ;;  %s695_s13 = sld [smem:[#allocation4 + $0x181]] }
  0x53   : > { %v455_v58 = vadd.f32 %v454_v52, %v451_v54  ;;  %v468_v59 = vmul.f32 %v467_v57, %v421_v31  ;;  %v470_v60 = vstv %s689_s9  ;;  %s696_s21 = sld [smem:[#allocation4 + $0x182]] }
  0x54   : > { %v443_v61 = vmax.f32 %v442_v56, 0.0  ;;  %v471_v63 = vmul.f32 %v470_v60, %v422_v32  ;;  %v474_v0 = vstv %s690_s28  ;;  %s697_s17 = sld [smem:[#allocation4 + $0x183]] }
  0x55   : > { %v459_v1 = vadd.f32 %v458_v55, %v455_v58  ;;  %v475_v2 = vmul.f32 %v474_v0, %v974_v33  ;;  %v478_v3 = vstv %s691_s10  ;;  %s698_s7 = sld [smem:[#allocation6 + $0x3]] }
  0x56   : > { %444 = vst [vmem:[%s991_s16] sm:$0x3] %v443_v61  ;;  %v472_v4 = vadd.f32 %v471_v63, %v468_v59  ;;  %v479_v5 = vmul.f32 %v478_v3, %v976_v34  ;;  %v482_v12 = vstv %s984_s11 }
  0x57   : > { %v462_v6 = vadd.f32 %v461_v62, %v459_v1  ;;  %v488_v7 = vstv %s694_s12 }
  0x58   : > { %v476_v8 = vadd.f32 %v475_v2, %v472_v4  ;;  %v489_v9 = vmul.f32 %v488_v7, %v421_v31  ;;  %v491_v10 = vstv %s695_s13 }
  0x59   : > { %v463_v11 = vmax.f32 %v462_v6, 0.0  ;;  %v492_v13 = vmul.f32 %v491_v10, %v422_v32  ;;  %v495_v14 = vstv %s696_s21 }
  0x5a   : > { %v480_v15 = vadd.f32 %v479_v5, %v476_v8  ;;  %v496_v16 = vmul.f32 %v495_v14, %v974_v33  ;;  %v499_v17 = vstv %s697_s17 }
  0x5b   : > { %687 = vst [vmem:[%s991_s16 + $0x2] sm:$0x3] %v463_v11  ;;  %v493_v18 = vadd.f32 %v492_v13, %v489_v9  ;;  %v500_v19 = vmul.f32 %v499_v17, %v976_v34  ;;  %v503_v23 = vstv %s698_s7 }
  0x5c   : > { %v483_v20 = vadd.f32 %v482_v12, %v480_v15 }
  0x5d   : > { %v497_v21 = vadd.f32 %v496_v16, %v493_v18 }
  0x5e   : > { %v484_v22 = vmax.f32 %v483_v20, 0.0 }
  0x5f   : > { %v501_v24 = vadd.f32 %v500_v19, %v497_v21 }
  0x60   : > { %693 = vst [vmem:[%s991_s16 + $0x4] sm:$0x3] %v484_v22 }
  0x61   : > { %v504_v25 = vadd.f32 %v503_v23, %v501_v24 }
  0x63   : > { %v505_v26 = vmax.f32 %v504_v25, 0.0 }
  0x65   : > { %699 = vst [vmem:[%s991_s16 + $0x6] sm:$0x3] %v505_v26 }
  0x66 PF: > { %s18_s23 = sadd.s32 1, %s836_s23   ;;  %s1028_s21 = smov %s832_s22 }
  0x67   : > { %p15_p5 = scmp.ge.s32.totalorder %s18_s23, 4   ;;  %s1029_s22 = smov %s1031_s30 }
  0x69   :  { %17 = sbr.rel (!%p15_p5) target bundleno = 3 (0x3), region = 96 }
  0x6e   :  { %535 = vsyncpa [#allocation3], 1 }
  0x6f   :  { %537 = vsyncpa [#allocation3 + $0x1], 1 }
  0x70   :  { %538 = vsyncpa [#allocation5], 1 }

</bundles_post_ra>
